<compile_context>
chip_gen: v6e
topology: v6e:2x2x1
jax: 0.10.0
libtpu: 0.0.40
codegen_flags: <defaults>
</compile_context>

<pallas_src>
import functools

import jax
import jax.numpy as jnp
from jax.experimental import pallas as pl
from jax.experimental.pallas import tpu as pltpu


def _round_up(n, m):
    return ((n + m - 1) // m) * m


# ----------------------------------------------------------------------------
# Fused MLP kernel: x -> [Linear + ReLU]* -> Linear (no activation)
# ----------------------------------------------------------------------------
def _mlp_fused_kernel(*refs, num_layers):
    # refs = (x_ref, w0_ref, b0_ref, w1_ref, b1_ref, ..., o_ref)
    x_ref = refs[0]
    o_ref = refs[-1]
    h = x_ref[...]
    for i in range(num_layers):
        w = refs[1 + 2 * i][...]          # (in_i_pad, out_i_pad), compute dtype
        b = refs[2 + 2 * i][...]          # (1, out_i_pad), f32
        h = jnp.dot(h.astype(w.dtype), w, preferred_element_type=jnp.float32)
        h = h + b                          # f32 bias add, broadcast over rows
        if i < num_layers - 1:
            h = jnp.maximum(h, 0.0)        # ReLU on hidden layers only
    o_ref[...] = h.astype(o_ref.dtype)


# ----------------------------------------------------------------------------
# Parameter init (deterministic, mimics torch.nn.Linear default init ranges)
# ----------------------------------------------------------------------------
def init_mlp_params(key, input_size, output_size, hidden_layer_sizes=()):
    """PyTorch Linear layout: weight (out_features, in_features), bias (out,)."""
    shapes = [input_size] + list(hidden_layer_sizes) + [output_size]
    params = []
    for fan_in, fan_out in zip(shapes[:-1], shapes[1:]):
        key, kw, kb = jax.random.split(key, 3)
        bound = 1.0 / (fan_in ** 0.5)
        w = jax.random.uniform(kw, (fan_out, fan_in), jnp.float32, -bound, bound)
        b = jax.random.uniform(kb, (fan_out,), jnp.float32, -bound, bound)
        params.append((w, b))
    return params


def prepare_params(params, *, compute_dtype=jnp.float32, lane_pad=128):
    """One-time prep (outside the forward pass):
      - transpose weights to (in, out) so the kernel computes x @ W^T as x @ w_t
      - reshape biases to (1, out) for in-kernel broadcast
      - zero-pad every layer's output width to a multiple of `lane_pad` and
        the next layer's input rows to match -> all activations lane-dense.
        (Padded columns get 0 bias -> pre-ReLU 0 -> ReLU 0, and padded rows
        of the next weight are 0, so results are exact.)
      - cast weights to compute_dtype (bf16 recommended on v6e/v7x)
    """
    prepared = []
    prev_out_pad = None   # padded input width expected by this layer
    for w, b in params:
        w_t = jnp.transpose(w)                       # (in, out)
        b2d = b.reshape(1, -1)                       # (1, out)
        in_dim, out_dim = w_t.shape
        out_pad = _round_up(out_dim, lane_pad)
        in_pad = in_dim if prev_out_pad is None else prev_out_pad
        w_t = jnp.pad(w_t, ((0, in_pad - in_dim), (0, out_pad - out_dim)))
        b2d = jnp.pad(b2d, ((0, 0), (0, out_pad - out_dim)))
        prepared.append((w_t.astype(compute_dtype), b2d.astype(jnp.float32)))
        prev_out_pad = out_pad
    return prepared


# ----------------------------------------------------------------------------
# MLPClassifier.forward equivalent (single fused pallas_call)
# ----------------------------------------------------------------------------
def mlp_classifier_forward(x, prepared_params, output_size, *, batch_tile=512,
                           vmem_limit_bytes=None):
    """hidden layers: Linear + ReLU; classifier (last layer): Linear only."""
    B, in_dim = x.shape
    num_layers = len(prepared_params)
    out_pad = prepared_params[-1][0].shape[1]   # lane-padded classifier width

    flat_wb = []
    for w_t, b2d in prepared_params:
        flat_wb.append(w_t)
        flat_wb.append(b2d)

    kernel = functools.partial(_mlp_fused_kernel, num_layers=num_layers)

    # Batch tile: multiple of 8 (f32 sublane); zero-pad any ragged batch.
    if B <= batch_tile:
        b_tile = _round_up(max(B, 1), 8)
    else:
        b_tile = batch_tile
    B_pad = _round_up(B, b_tile)
    if B_pad != B:
        x = jnp.pad(x, ((0, B_pad - B), (0, 0)))
    n_tiles = B_pad // b_tile

    out_shape = jax.ShapeDtypeStruct((B_pad, out_pad), jnp.float32)

    if n_tiles == 1:
        # Single invocation: no grid -> no useless double buffering / pipeline
        # prologue; full arrays become single VMEM blocks.
        out = pl.pallas_call(kernel, out_shape=out_shape)(x, *flat_wb)
    else:
        in_specs = [pl.BlockSpec((b_tile, in_dim), lambda i: (i, 0))]
        for w_t, b2d in prepared_params:
            # Same block index every step -> weights/biases stay VMEM-resident.
            in_specs.append(pl.BlockSpec(w_t.shape, lambda i: (0, 0)))
            in_specs.append(pl.BlockSpec(b2d.shape, lambda i: (0, 0)))
        out = pl.pallas_call(
            kernel,
            out_shape=out_shape,
            grid=(n_tiles,),
            in_specs=in_specs,
            out_specs=pl.BlockSpec((b_tile, out_pad), lambda i: (i, 0)),
            compiler_params=pltpu.CompilerParams(
                # Batch tiles are independent -> shard across v7x's 2 TCs.
                dimension_semantics=("parallel",),
                vmem_limit_bytes=vmem_limit_bytes,
            ),
        )(x, *flat_wb)

    # Slice away batch padding and lane padding outside the kernel.
    return out[:B, :output_size]


def mlp_classifier_reference(x, params):
    """Plain-JAX reference (uses original PyTorch-layout params)."""
    n = len(params)
    for i, (w, b) in enumerate(params):
        x = x @ w.T + b
        if i < n - 1:
            x = jnp.maximum(x, 0.0)
    return x


if __name__ == "__main__":
    # MLPClassifier(input_size=32, output_size=10, hidden_layer_sizes=(64, 48))
    input_size, output_size, hidden_layer_sizes = 32, 10, (64, 48)

    key = jax.random.PRNGKey(0)
    key, kx_small, kx_grid = jax.random.split(key, 3)
    params = init_mlp_params(key, input_size, output_size, hidden_layer_sizes)
    prepared_f32 = prepare_params(params, compute_dtype=jnp.float32)

    # --- small batch: single fused no-grid invocation -------------------------
    x_small = jax.random.normal(kx_small, (8, input_size), dtype=jnp.float32)
    out_small = jax.block_until_ready(
        mlp_classifier_forward(x_small, prepared_f32, output_size))
    ref_small = mlp_classifier_reference(x_small, params)
    assert out_small.shape == (8, output_size)
    assert jnp.allclose(out_small, ref_small, atol=1e-4, rtol=1e-4)

    # --- batch-tiled grid path: weights VMEM-resident, parallel batch axis ----
    x_grid = jax.random.normal(kx_grid, (64, input_size), dtype=jnp.float32)
    out_grid = jax.block_until_ready(
        mlp_classifier_forward(x_grid, prepared_f32, output_size, batch_tile=32))
    ref_grid = mlp_classifier_reference(x_grid, params)
    assert out_grid.shape == (64, output_size)
    assert jnp.allclose(out_grid, ref_grid, atol=1e-4, rtol=1e-4)

    # --- bf16 operands / f32 accumulation (v6e/v7x MXU path) ------------------
    prepared_bf16 = prepare_params(params, compute_dtype=jnp.bfloat16)
    out_bf16 = jax.block_until_ready(
        mlp_classifier_forward(x_grid, prepared_bf16, output_size, batch_tile=32))
    assert out_bf16.shape == (64, output_size)
    assert jnp.allclose(out_bf16, ref_grid, atol=1e-1, rtol=1e-1)

    print("KERNEL_OK")
</pallas_src>

<mosaic_0001>
module attributes {stable_mosaic.version = 11 : i64} {
  func.func @_mlp_fused_kernel(%arg0: memref<8x32xf32, #tpu.memory_space<vmem>>, %arg1: memref<32x128xf32, #tpu.memory_space<vmem>>, %arg2: memref<1x128xf32, #tpu.memory_space<vmem>>, %arg3: memref<128x128xf32, #tpu.memory_space<vmem>>, %arg4: memref<1x128xf32, #tpu.memory_space<vmem>>, %arg5: memref<128x128xf32, #tpu.memory_space<vmem>>, %arg6: memref<1x128xf32, #tpu.memory_space<vmem>>, %arg7: memref<8x128xf32, #tpu.memory_space<vmem>>) attributes {dimension_semantics = [], scalar_prefetch = 0 : i64, scratch_operands = 0 : i64, tpu.core_type = #tpu.core_type<tc>} {
    %c0 = arith.constant 0 : index
    %c0_0 = arith.constant 0 : index
    %0 = vector.load %arg0[%c0, %c0_0] : memref<8x32xf32, #tpu.memory_space<vmem>>, vector<8x32xf32>
    %c0_1 = arith.constant 0 : index
    %c0_2 = arith.constant 0 : index
    %1 = vector.load %arg1[%c0_1, %c0_2] : memref<32x128xf32, #tpu.memory_space<vmem>>, vector<32x128xf32>
    %c0_3 = arith.constant 0 : index
    %c0_4 = arith.constant 0 : index
    %2 = vector.load %arg2[%c0_3, %c0_4] : memref<1x128xf32, #tpu.memory_space<vmem>>, vector<1x128xf32>
    %cst = arith.constant dense<0.000000e+00> : vector<8x128xf32>
    %3 = tpu.matmul %0, %1, %cst {dimension_numbers = #tpu.dot_dimension_numbers<[1], [0], [0], [1], [0, 0, 1, 1], [], []>} : vector<8x32xf32>, vector<32x128xf32>, vector<8x128xf32> -> vector<8x128xf32>
    %4 = vector.broadcast %2 : vector<1x128xf32> to vector<8x128xf32>
    %5 = arith.addf %3, %4 : vector<8x128xf32>
    %cst_5 = arith.constant 0.000000e+00 : f32
    %6 = vector.broadcast %cst_5 : f32 to vector<8x128xf32>
    %7 = arith.maximumf %5, %6 : vector<8x128xf32>
    %c0_6 = arith.constant 0 : index
    %c0_7 = arith.constant 0 : index
    %8 = vector.load %arg3[%c0_6, %c0_7] : memref<128x128xf32, #tpu.memory_space<vmem>>, vector<128x128xf32>
    %c0_8 = arith.constant 0 : index
    %c0_9 = arith.constant 0 : index
    %9 = vector.load %arg4[%c0_8, %c0_9] : memref<1x128xf32, #tpu.memory_space<vmem>>, vector<1x128xf32>
    %cst_10 = arith.constant dense<0.000000e+00> : vector<8x128xf32>
    %10 = tpu.matmul %7, %8, %cst_10 {dimension_numbers = #tpu.dot_dimension_numbers<[1], [0], [0], [1], [0, 0, 1, 1], [], []>} : vector<8x128xf32>, vector<128x128xf32>, vector<8x128xf32> -> vector<8x128xf32>
    %11 = vector.broadcast %9 : vector<1x128xf32> to vector<8x128xf32>
    %12 = arith.addf %10, %11 : vector<8x128xf32>
    %cst_11 = arith.constant 0.000000e+00 : f32
    %13 = vector.broadcast %cst_11 : f32 to vector<8x128xf32>
    %14 = arith.maximumf %12, %13 : vector<8x128xf32>
    %c0_12 = arith.constant 0 : index
    %c0_13 = arith.constant 0 : index
    %15 = vector.load %arg5[%c0_12, %c0_13] : memref<128x128xf32, #tpu.memory_space<vmem>>, vector<128x128xf32>
    %c0_14 = arith.constant 0 : index
    %c0_15 = arith.constant 0 : index
    %16 = vector.load %arg6[%c0_14, %c0_15] : memref<1x128xf32, #tpu.memory_space<vmem>>, vector<1x128xf32>
    %cst_16 = arith.constant dense<0.000000e+00> : vector<8x128xf32>
    %17 = tpu.matmul %14, %15, %cst_16 {dimension_numbers = #tpu.dot_dimension_numbers<[1], [0], [0], [1], [0, 0, 1, 1], [], []>} : vector<8x128xf32>, vector<128x128xf32>, vector<8x128xf32> -> vector<8x128xf32>
    %18 = vector.broadcast %16 : vector<1x128xf32> to vector<8x128xf32>
    %19 = arith.addf %17, %18 : vector<8x128xf32>
    %c0_17 = arith.constant 0 : index
    %c0_18 = arith.constant 0 : index
    %20 = vector.load %arg7[%c0_17, %c0_18] : memref<8x128xf32, #tpu.memory_space<vmem>>, vector<8x128xf32>
    tpu.vector_store %arg7[%c0_17, %c0_18], %19 {strides = array<i32>} : memref<8x128xf32, #tpu.memory_space<vmem>>, vector<8x128xf32>,
    return
  }
}

</mosaic_0001>

<bundles_post_ra>
// kernel: tpu_custom_call.1
= control target key start
LH: loop header
LB: loop body
LE: loop exit
PB: predicated region body
PF: predicated region fallthrough
CT: control target
= control target key end

     0   :  { %12 = vsyncpa [#allocation3], 0  ;;  %s737_s0 = inlined_call_operand.hbm [shape: f32[8,32], index: 0, kind: input, shape index: {}]   ;;  %s738_s1 = inlined_call_operand.hbm [shape: f32[32,128], index: 1, kind: input, shape index: {}]   ;;  %s739_s2 = inlined_call_operand.vmem [shape: f32[1,128], index: 2, kind: input, shape index: {}]   ;;  %s740_s3 = inlined_call_operand.hbm [shape: f32[128,128], index: 3, kind: input, shape index: {}]   ;;  %s741_s4 = inlined_call_operand.vmem [shape: f32[1,128], index: 4, kind: input, shape index: {}]   ;;  %s742_s5 = inlined_call_operand.hbm [shape: f32[128,128], index: 5, kind: input, shape index: {}]   ;;  %s743_s6 = inlined_call_operand.vmem [shape: f32[1,128], index: 6, kind: input, shape index: {}]   ;;  %s744_s7 = inlined_call_operand.hbm [shape: f32[8,128], index: 7, kind: output, shape index: {}]  }
   0x1   :  { %13 = vsyncpa [#allocation6], 0 }
   0x2   :  { %14 = vsyncpa [#allocation9], 0 }
   0x3   :  { %15 = vsyncpa [#allocation4], 0  ;;  %s613_s24 = smov [#allocation5]  }
   0x4   :  { %s31_s25 = sshll.u32 %s613_s24, 4  ;;  %s32_s25 = int_to_ptr.vmem [resolvable:$true] %s31_s25 }
   0x5   :  { %s513_s26 = scalar_lea.vmem %s32_s25, 512  ;;  %p518_p1 = scmp.lt.s32.totalorder %s32_s25, %s32_s25 }
   0x6   :  { %p514_p0 = scmp.ne.s32.totalorder %s32_s25, %s513_s26  ;;  %p519_p2 = scmp.lt.s32.totalorder %s513_s26, %s513_s26 }
   0x8   :  { %p520_p3 = por %p519_p2, %p518_p1 }
   0xa   :  { %p521_p4 = pnand %p520_p3, %p514_p0 }
   0xc   :  { %524 = shalt.err (!%p521_p4)
}
   0xd   :  { %s614_s27 = smov 128   ;;  %s615_s28 = smov 8  }
   0xe   :  { %37 = dma.hbm_to_vmem [thread:$0]  %s738_s1, 512, %s32_s25, [#allocation6], %s614_s27, %s614_s27, %s615_s28  }
   0xf   :  { %s616_s8 = smov [#allocation2]   ;;  %s617_s10 = smov [#allocation7]  }
  0x10   :  { %s22_s9 = sshll.u32 %s616_s8, 4  ;;  %s45_s11 = sshll.u32 %s617_s10, 4  ;;  %s23_s9 = int_to_ptr.vmem [resolvable:$true] %s22_s9  ;;  %s46_s11 = int_to_ptr.vmem [resolvable:$true] %s45_s11 }
  0x11   :  { %s533_s12 = scalar_lea.vmem %s23_s9, 128  ;;  %p538_p6 = scmp.lt.s32.totalorder %s23_s9, %s23_s9 }
  0x12   :  { %p534_p5 = scmp.ne.s32.totalorder %s23_s9, %s533_s12  ;;  %p539_p7 = scmp.lt.s32.totalorder %s533_s12, %s533_s12 }
  0x14   :  { %p540_p8 = por %p539_p7, %p538_p6 }
  0x16   :  { %p541_p9 = pnand %p540_p8, %p534_p5 }
  0x18   :  { %544 = shalt.err (!%p541_p9)
}
  0x19   :  { %25 = dma.hbm_to_vmem [thread:$0]  %s737_s0, 128, %s23_s9, [#allocation3]  }
  0x1a   :  { %s553_s15 = scalar_lea.vmem %s46_s11, 2048  ;;  %p558_p11 = scmp.lt.s32.totalorder %s46_s11, %s46_s11 }
  0x1b   :  { %p554_p10 = scmp.ne.s32.totalorder %s46_s11, %s553_s15  ;;  %p559_p12 = scmp.lt.s32.totalorder %s553_s15, %s553_s15 }
  0x1d   :  { %p560_p13 = por %p559_p12, %p558_p11 }
  0x1f   :  { %p561_p0 = pnand %p560_p13, %p554_p10 }
  0x21   :  { %564 = shalt.err (!%p561_p0)
}
  0x22   :  { %51 = dma.hbm_to_vmem [thread:$0]  %s740_s3, 2048, %s46_s11, [#allocation6], %s614_s27, %s614_s27, %s615_s28  }
  0x23   :  { %s618_s17 = smov [#allocation8]  }
  0x24   :  { %s59_s18 = sshll.u32 %s618_s17, 4  ;;  %s60_s18 = int_to_ptr.vmem [resolvable:$true] %s59_s18 }
  0x25   :  { %s573_s19 = scalar_lea.vmem %s60_s18, 2048  ;;  %p578_p2 = scmp.lt.s32.totalorder %s60_s18, %s60_s18 }
  0x26   :  { %p574_p1 = scmp.ne.s32.totalorder %s60_s18, %s573_s19  ;;  %p579_p3 = scmp.lt.s32.totalorder %s573_s19, %s573_s19 }
  0x28   :  { %p580_p4 = por %p579_p3, %p578_p2 }
  0x2a   :  { %p581_p5 = pnand %p580_p4, %p574_p1 }
  0x2c   :  { %584 = shalt.err (!%p581_p5)
}
  0x2d   :  { %65 = dma.hbm_to_vmem [thread:$0]  %s742_s5, 2048, %s60_s18, [#allocation9], %s614_s27, %s614_s27, %s615_s28  }
  0x2e   :  { %605 = dma.done.wait [#allocation3], 128  }
  0x2f   :  { %606 = vsyncadd [#allocation3], 4294967168 }
  0x30   :  { %607 = dma.done.wait [#allocation6], 2560  }
  0x31   :  { %608 = vsyncadd [#allocation6], 4294964736 }
  0x32   :  { %609 = dma.done.wait [#allocation9], 2048  }
  0x33   :  { %610 = vsyncadd [#allocation9], 4294965248  ;;  %v619_v0 = vmov 0.0   ;;  %vm620_vm0 = vmmov 0   ;;  %v84_v1 = vld [vmem:[#allocation5 + $0x18] sm:$0xff]  ;;  %v83_v2 = vld [vmem:[#allocation5 + $0x10] sm:$0xff] }
  0x34   :  { %415 = vmatprep.subr.mxu0 %v619_v0  ;;  %423 = vmatprep.mubr.msk.f32.mxu0 %vm620_vm0, %v619_v0  ;;  %v182_v3 = vld [vmem:[#allocation7 + $0x78] sm:$0xff]  ;;  %v82_v4 = vld [vmem:[#allocation5 + $0x8] sm:$0xff]  ;;  %v181_v5 = vld [vmem:[#allocation7 + $0x70] sm:$0xff]  ;;  %vm92_vm1 = vcmask 261120   ;;  %s621_s24 = smov [#allocation10]  }
  0x35   :  { %426 = vmatprep.subr.mxu1 %v619_v0  ;;  %458 = vmatprep.mubr.msk.f32.mxu1 %vm620_vm0, %v619_v0  ;;  %v180_v6 = vld [vmem:[#allocation7 + $0x68] sm:$0xff]  ;;  %v81_v7 = vld [vmem:[#allocation5] sm:$0xff]  ;;  %v80_v8 = vld [vmem:[#allocation2] sm:$0xff]  ;;  %s361_s25 = sshll.u32 %s621_s24, 4  ;;  %s362_s25 = int_to_ptr.vmem [resolvable:$true] %s361_s25 }
  0x36   :  { %416 = vmatpush3.msra.mxu0 %v84_v1  ;;  %427 = vmatpush3.msra.mxu1 %v182_v3  ;;  %v179_v9 = vld [vmem:[#allocation7 + $0x60] sm:$0xff]  ;;  %v178_v10 = vld [vmem:[#allocation7 + $0x58] sm:$0xff]  ;;  %v177_v11 = vld [vmem:[#allocation7 + $0x50] sm:$0xff]  ;;  %s585_s26 = scalar_lea.vmem %s362_s25, 128  ;;  %p590_p7 = scmp.lt.s32.totalorder %s362_s25, %s362_s25 }
  0x37   :  { %417 = vmatprep.subr.mxu0 %v619_v0  ;;  %428 = vmatprep.subr.mxu1 %v619_v0  ;;  %v176_v12 = vld [vmem:[#allocation7 + $0x48] sm:$0xff]  ;;  %v175_v13 = vld [vmem:[#allocation7 + $0x40] sm:$0xff]  ;;  %v174_v14 = vld [vmem:[#allocation7 + $0x38] sm:$0xff]  ;;  %p586_p6 = scmp.ne.s32.totalorder %s362_s25, %s585_s26  ;;  %p591_p8 = scmp.lt.s32.totalorder %s585_s26, %s585_s26 }
  0x38   :  { %418 = vmatpush3.msra.mxu0 %v83_v2  ;;  %429 = vmatpush3.msra.mxu1 %v181_v5  ;;  %v173_v15 = vld [vmem:[#allocation7 + $0x30] sm:$0xff]  ;;  %v172_v16 = vld [vmem:[#allocation7 + $0x28] sm:$0xff]  ;;  %v171_v17 = vld [vmem:[#allocation7 + $0x20] sm:$0xff] }
  0x39   :  { %419 = vmatprep.subr.mxu0 %v619_v0  ;;  %430 = vmatprep.subr.mxu1 %v619_v0  ;;  %v170_v18 = vld [vmem:[#allocation7 + $0x18] sm:$0xff]  ;;  %v169_v19 = vld [vmem:[#allocation7 + $0x10] sm:$0xff]  ;;  %v168_v20 = vld [vmem:[#allocation7 + $0x8] sm:$0xff]  ;;  %p592_p9 = por %p591_p8, %p590_p7 }
  0x3a   :  { %420 = vmatpush3.msra.mxu0 %v82_v4  ;;  %431 = vmatpush3.msra.mxu1 %v180_v6  ;;  %v167_v21 = vld [vmem:[#allocation7] sm:$0xff]  ;;  %v276_v22 = vld [vmem:[#allocation8 + $0x78] sm:$0xff]  ;;  %v275_v23 = vld [vmem:[#allocation8 + $0x70] sm:$0xff] }
  0x3b   :  { %421 = vmatprep.subr.mxu0 %v619_v0  ;;  %432 = vmatprep.subr.mxu1 %v619_v0  ;;  %v274_v24 = vld [vmem:[#allocation8 + $0x68] sm:$0xff]  ;;  %v273_v25 = vld [vmem:[#allocation8 + $0x60] sm:$0xff]  ;;  %v272_v26 = vld [vmem:[#allocation8 + $0x58] sm:$0xff]  ;;  %p593_p10 = pnand %p592_p9, %p586_p6 }
  0x3c   :  { %422 = vmatpush3.msra.mxu0 %v81_v7  ;;  %433 = vmatpush3.msra.mxu1 %v179_v9  ;;  %v271_v27 = vld [vmem:[#allocation8 + $0x50] sm:$0xff]  ;;  %v270_v28 = vld [vmem:[#allocation8 + $0x48] sm:$0xff]  ;;  %v269_v29 = vld [vmem:[#allocation8 + $0x40] sm:$0xff] }
  0x3d   :  { %424 = vmatmul.mubr.msk.f32.vlgmr.msra.gmra.mxu0 %vm92_vm1, %v80_v8  ;;  %434 = vmatprep.subr.mxu1 %v619_v0  ;;  %v268_v30 = vld [vmem:[#allocation8 + $0x38] sm:$0xff]  ;;  %v267_v31 = vld [vmem:[#allocation8 + $0x30] sm:$0xff]  ;;  %v266_v32 = vld [vmem:[#allocation8 + $0x28] sm:$0xff] }
  0x3e   :  { %461 = vmatprep.subr.mxu0 %v619_v0  ;;  %435 = vmatpush3.msra.mxu1 %v178_v10  ;;  %v265_v33 = vld [vmem:[#allocation8 + $0x20] sm:$0xff]  ;;  %v264_v34 = vld [vmem:[#allocation8 + $0x18] sm:$0xff]  ;;  %v263_v40 = vld [vmem:[#allocation8 + $0x10] sm:$0xff] }
  0x3f   :  { %493 = vmatprep.mubr.msk.f32.mxu0 %vm620_vm0, %v619_v0  ;;  %436 = vmatprep.subr.mxu1 %v619_v0  ;;  %v372_v35 = vld [vmem:[%s739_s2] ss:$0 sm:$0xff]  ;;  %v262_v41 = vld [vmem:[#allocation8 + $0x8] sm:$0xff]  ;;  %v261_v42 = vld [vmem:[#allocation8] sm:$0xff] }
  0x40   :  { %437 = vmatpush3.msra.mxu1 %v177_v11  ;;  %462 = vmatpush3.msra.mxu0 %v276_v22  ;;  %v374_v43 = vld [vmem:[%s741_s4] ss:$0 sm:$0xff] }
  0x41   :  { %438 = vmatprep.subr.mxu1 %v619_v0  ;;  %463 = vmatprep.subr.mxu0 %v619_v0  ;;  %v375_v48 = vld [vmem:[%s743_s6] ss:$0 sm:$0xff] }
  0x42   :  { %439 = vmatpush3.msra.mxu1 %v176_v12  ;;  %464 = vmatpush3.msra.mxu0 %v275_v23 }
  0x43   :  { %440 = vmatprep.subr.mxu1 %v619_v0  ;;  %465 = vmatprep.subr.mxu0 %v619_v0 }
  0x44   :  { %441 = vmatpush3.msra.mxu1 %v175_v13  ;;  %466 = vmatpush3.msra.mxu0 %v274_v24 }
  0x45   :  { %442 = vmatprep.subr.mxu1 %v619_v0  ;;  %467 = vmatprep.subr.mxu0 %v619_v0 }
  0x46   :  { %443 = vmatpush3.msra.mxu1 %v174_v14  ;;  %468 = vmatpush3.msra.mxu0 %v273_v25 }
  0x47   :  { %444 = vmatprep.subr.mxu1 %v619_v0  ;;  %469 = vmatprep.subr.mxu0 %v619_v0 }
  0x48   :  { %445 = vmatpush3.msra.mxu1 %v173_v15  ;;  %470 = vmatpush3.msra.mxu0 %v272_v26 }
  0x49   :  { %446 = vmatprep.subr.mxu1 %v619_v0  ;;  %471 = vmatprep.subr.mxu0 %v619_v0 }
  0x4a   :  { %447 = vmatpush3.msra.mxu1 %v172_v16  ;;  %472 = vmatpush3.msra.mxu0 %v271_v27 }
  0x4b   :  { %448 = vmatprep.subr.mxu1 %v619_v0  ;;  %473 = vmatprep.subr.mxu0 %v619_v0 }
  0x4c   :  { %449 = vmatpush3.msra.mxu1 %v171_v17  ;;  %474 = vmatpush3.msra.mxu0 %v270_v28 }
  0x4d   :  { %450 = vmatprep.subr.mxu1 %v619_v0  ;;  %475 = vmatprep.subr.mxu0 %v619_v0 }
  0x4e   :  { %451 = vmatpush3.msra.mxu1 %v170_v18  ;;  %476 = vmatpush3.msra.mxu0 %v269_v29 }
  0x4f   :  { %452 = vmatprep.subr.mxu1 %v619_v0  ;;  %477 = vmatprep.subr.mxu0 %v619_v0 }
  0x50   :  { %453 = vmatpush3.msra.mxu1 %v169_v19  ;;  %478 = vmatpush3.msra.mxu0 %v268_v30 }
  0x51   :  { %454 = vmatprep.subr.mxu1 %v619_v0  ;;  %479 = vmatprep.subr.mxu0 %v619_v0 }
  0x52   :  { %455 = vmatpush3.msra.mxu1 %v168_v20  ;;  %480 = vmatpush3.msra.mxu0 %v267_v31 }
  0x53   :  { %456 = vmatprep.subr.mxu1 %v619_v0  ;;  %481 = vmatprep.subr.mxu0 %v619_v0 }
  0x54   :  { %457 = vmatpush3.msra.mxu1 %v167_v21  ;;  %482 = vmatpush3.msra.mxu0 %v266_v32 }
  0x55   :  { %483 = vmatprep.subr.mxu0 %v619_v0 }
  0x56   :  { %484 = vmatpush3.msra.mxu0 %v265_v33 }
  0x57   :  { %485 = vmatprep.subr.mxu0 %v619_v0 }
  0x58   :  { %486 = vmatpush3.msra.mxu0 %v264_v34 }
  0x59   :  { %487 = vmatprep.subr.mxu0 %v619_v0 }
  0x5a   :  { %488 = vmatpush3.msra.mxu0 %v263_v40 }
  0x5b   :  { %489 = vmatprep.subr.mxu0 %v619_v0 }
  0x5c   :  { %490 = vmatpush3.msra.mxu0 %v262_v41 }
  0x5d   :  { %491 = vmatprep.subr.mxu0 %v619_v0 }
  0x5e   :  { %492 = vmatpush3.msra.mxu0 %v261_v42 }
  0xfd   :  { %v162_v36 = vpop.f32.mrf.mxu0 }
  0xfe   :  { %v163_v37 = vadd.f32 %v372_v35, %v162_v36 }
  0xff   :  { %v425_v38 = vpop.f32.mrf.mxu0 }
 0x100   :  { %v166_v39 = vmax.f32 %v163_v37, 0.0 }
 0x102   :  { %459 = vmatmul.mubr.f32.vlgmr.msra.gmra.mxu1 %v166_v39 }
 0x1c2   :  { %v256_v44 = vpop.f32.mrf.mxu1 }
 0x1c3   :  { %v257_v45 = vadd.f32 %v374_v43, %v256_v44 }
 0x1c4   :  { %v460_v46 = vpop.f32.mrf.mxu1 }
 0x1c5   :  { %v260_v47 = vmax.f32 %v257_v45, 0.0 }
 0x1c7   :  { %494 = vmatmul.mubr.f32.vlgmr.msra.gmra.mxu0 %v260_v47 }
 0x287   :  { %v350_v49 = vpop.f32.mrf.mxu0 }
 0x288   :  { %v351_v50 = vadd.f32 %v375_v48, %v350_v49 }
 0x289   :  { %v495_v51 = vpop.f32.mrf.mxu0 }
 0x28a   :  { %354 = vst [vmem:[#allocation10] sm:$0xff] %v351_v50 }
 0x28b   :  { %596 = shalt.err (!%p593_p10)
}
 0x28c   :  { %364 = dma.vmem_to_hbm [thread:$0]  %s362_s25, 128, %s744_s7, [#allocation4]  }
 0x28d   :  { %611 = dma.done.wait [#allocation4], 128  }
 0x28e   :  { %612 = vsyncadd [#allocation4], 4294967168 }
 0x28f   :  { %368 = vsyncpa [#allocation3], 1 }
 0x290   :  { %369 = vsyncpa [#allocation6], 1 }
 0x291   :  { %370 = vsyncpa [#allocation9], 1 }
 0x292   :  { %371 = vsyncpa [#allocation4], 1 }

</bundles_post_ra>
